<compile_context>
chip_gen: v7x
topology: tpu7x:2x2x1
jax: 0.10.0
libtpu: 0.0.40
codegen_flags: <defaults>
</compile_context>

<pallas_src>
import functools

import jax
import jax.numpy as jnp
from jax import lax
from jax.experimental import pallas as pl
from jax.experimental.pallas import tpu as pltpu

MM_TILE_M = 2048                      # row tile for the conv1 im2col matmul


def _round_up(n, m):
    return (n + m - 1) // m * m


def _vmem_limit_bytes():
    # Generation-aware scoped-VMEM limit (review item): ~half of physical,
    # capped at 64 MiB; conservative 32 MiB fallback if the query fails.
    try:
        cap = pltpu.get_tpu_info().vmem_capacity_bytes
        return int(min(cap // 2, 64 * 1024 * 1024))
    except Exception:
        return 32 * 1024 * 1024


VMEM_LIMIT = _vmem_limit_bytes()


def _pick_row_tile(h):
    """Largest divisor of h in [4,16] giving >=2 row tiles (else whole image)."""
    for th in range(min(h // 2, 16), 3, -1):
        if h % th == 0:
            return th
    return h


# ---------------------------------------------------------------------------
# Pallas kernels
# ---------------------------------------------------------------------------
def _conv3x3_body(x_ref, w_ref, s_ref, c_ref, r_ref, o_ref, *, reflect, act):
    """3x3 stride-1 conv on one row slab, halo-padded in VMEM, bf16 MXU operands.

    x_ref: (1, H, W, Cin)   whole (unpadded) image, bf16, resident across slabs
    w_ref: (9, Cin, Cout)   per-tap weights, bf16
    s_ref, c_ref: (1, Cout) folded BatchNorm scale / shift, f32
    r_ref: (1, TH, W, Cout) optional residual slab (bf16) or None
    o_ref: (1, TH, W, Cout) output slab
    """
    TH, W, Cout = o_ref.shape[1], o_ref.shape[2], o_ref.shape[3]
    H, Cin = x_ref.shape[1], x_ref.shape[3]
    i = pl.program_id(1)
    r0 = i * TH

    core = x_ref[0, pl.ds(r0, TH)]                               # (TH, W, Cin)
    if reflect:
        top_idx = jnp.where(r0 == 0, 1, r0 - 1)
        bot_idx = jnp.where(r0 + TH == H, H - 2, r0 + TH)
        top = x_ref[0, pl.ds(top_idx, 1)]
        bot = x_ref[0, pl.ds(bot_idx, 1)]
    else:
        top = x_ref[0, pl.ds(jnp.maximum(r0 - 1, 0), 1)]
        bot = x_ref[0, pl.ds(jnp.minimum(r0 + TH, H - 1), 1)]
        zero_row = jnp.zeros_like(top)
        top = jnp.where(r0 == 0, zero_row, top)
        bot = jnp.where(r0 + TH == H, zero_row, bot)
    xs = jnp.concatenate([top, core, bot], axis=0)               # (TH+2, W, Cin)
    if reflect:
        left, right = xs[:, 1:2, :], xs[:, W - 2:W - 1, :]
    else:
        left = jnp.zeros((TH + 2, 1, Cin), xs.dtype)
        right = left
    xs = jnp.concatenate([left, xs, right], axis=1)              # (TH+2, W+2, Cin)

    # TODO(synk): v6e -- fold kw into the contraction (3 matmuls, K=3*Cin)
    # instead of 9 K=Cin matmuls to improve MXU occupancy.
    acc = jnp.zeros((TH * W, Cout), jnp.float32)
    for t in range(9):                                           # unrolled taps
        di, dj = t // 3, t % 3
        patch = xs[di:di + TH, dj:dj + W, :].reshape(TH * W, Cin)   # bf16
        acc = acc + jnp.dot(patch, w_ref[t], preferred_element_type=jnp.float32)

    y = acc * s_ref[...] + c_ref[...]
    if r_ref is not None:
        y = y + r_ref[0].astype(jnp.float32).reshape(TH * W, Cout)
    if act == "relu":
        y = jnp.maximum(y, 0.0)
    elif act == "tanh":
        y = jnp.tanh(y)
    # TODO(synk): Cout=64 stores are half-masked; present (N,H,W*C) lane-dense
    # output if profiling shows the store phase exposed (review item 10).
    o_ref[...] = y.reshape(1, TH, W, Cout).astype(o_ref.dtype)


def _conv3x3_kernel(x_ref, w_ref, s_ref, c_ref, o_ref, *, reflect, act):
    _conv3x3_body(x_ref, w_ref, s_ref, c_ref, None, o_ref, reflect=reflect, act=act)


def _conv3x3_res_kernel(x_ref, w_ref, s_ref, c_ref, r_ref, o_ref, *, reflect, act):
    _conv3x3_body(x_ref, w_ref, s_ref, c_ref, r_ref, o_ref, reflect=reflect, act=act)


def _mm_bn_kernel(a_ref, b_ref, s_ref, c_ref, o_ref, *, act):
    """o = act((A @ B) * scale + shift); A/B bf16, f32 accumulate + epilogue."""
    acc = jnp.dot(a_ref[...], b_ref[...], preferred_element_type=jnp.float32)
    y = acc * s_ref[...] + c_ref[...]
    if act == "relu":
        y = jnp.maximum(y, 0.0)
    elif act == "tanh":
        y = jnp.tanh(y)
    o_ref[...] = y.astype(o_ref.dtype)


# ---------------------------------------------------------------------------
# Wrappers
# ---------------------------------------------------------------------------
def conv3x3_taps(x, w_taps, scale, shift, *, pad_mode="constant", residual=None,
                 act="none", out_dtype=jnp.bfloat16):
    """3x3/stride-1/pad-1 conv, fused BN/residual/act, row-slab grid."""
    N, H, W, Cin = x.shape
    T, Cin2, Cout = w_taps.shape
    assert T == 9 and Cin2 == Cin
    TH = _pick_row_tile(H)
    HT = H // TH
    reflect = (pad_mode == "reflect")
    args = [x.astype(jnp.bfloat16),
            w_taps.astype(jnp.bfloat16),
            scale.reshape(1, Cout).astype(jnp.float32),
            shift.reshape(1, Cout).astype(jnp.float32)]
    in_specs = [
        pl.BlockSpec((1, H, W, Cin), lambda n, i: (n, 0, 0, 0)),   # resident
        pl.BlockSpec((9, Cin, Cout), lambda n, i: (0, 0, 0)),
        pl.BlockSpec((1, Cout), lambda n, i: (0, 0)),
        pl.BlockSpec((1, Cout), lambda n, i: (0, 0)),
    ]
    if residual is not None:
        args.append(residual.astype(jnp.bfloat16))
        in_specs.append(pl.BlockSpec((1, TH, W, Cout), lambda n, i: (n, i, 0, 0)))
        kernel = functools.partial(_conv3x3_res_kernel, reflect=reflect, act=act)
    else:
        kernel = functools.partial(_conv3x3_kernel, reflect=reflect, act=act)
    return pl.pallas_call(
        kernel,
        out_shape=jax.ShapeDtypeStruct((N, H, W, Cout), out_dtype),
        grid=(N, HT),
        in_specs=in_specs,
        out_specs=pl.BlockSpec((1, TH, W, Cout), lambda n, i: (n, i, 0, 0)),
        compiler_params=pltpu.CompilerParams(
            dimension_semantics=("parallel", "parallel"),
            vmem_limit_bytes=VMEM_LIMIT),
    )(*args)


def conv3x3_bn(x, w, scale, shift, *, pad_mode="constant", residual=None,
               act="none"):
    Cin, Cout = w.shape[2], w.shape[3]
    return conv3x3_taps(x, w.reshape(9, Cin, Cout), scale, shift,
                        pad_mode=pad_mode, residual=residual, act=act)


def _im2col(x, kh, kw, stride, pad):
    if pad > 0:
        x = jnp.pad(x, ((0, 0), (pad, pad), (pad, pad), (0, 0)))
    _, Hp, Wp, _ = x.shape
    Ho = (Hp - kh) // stride + 1
    Wo = (Wp - kw) // stride + 1
    cols = [x[:, i:i + (Ho - 1) * stride + 1:stride,
                 j:j + (Wo - 1) * stride + 1:stride, :]
            for i in range(kh) for j in range(kw)]
    return jnp.stack(cols, axis=3), Ho, Wo      # (N, Ho, Wo, kh*kw, C)


def conv2d_im2col_bn(x, w, stride, pad, scale, shift, act="relu",
                     out_dtype=jnp.bfloat16):
    """Large-K conv (conv1, Cin=3) as im2col + Pallas matmul with fused BN/act."""
    N, H, W, Cin = x.shape
    KH, KW, _, Cout = w.shape
    patches, Ho, Wo = _im2col(x, KH, KW, stride, pad)
    M = N * Ho * Wo
    K = KH * KW * Cin
    Kp = _round_up(K, 128)                      # 147 -> 256: clean (8,128) tiles
    A = patches.reshape(M, K)
    B = w.reshape(K, Cout)
    if Kp != K:
        A = jnp.pad(A, ((0, 0), (0, Kp - K)))
        B = jnp.pad(B, ((0, Kp - K), (0, 0)))
    tm = MM_TILE_M
    if M < 2 * tm:                              # keep >= 2 grid steps
        tm = max(8, _round_up((M + 1) // 2, 8))
    Mp = _round_up(M, tm)
    if Mp != M:
        A = jnp.pad(A, ((0, Mp - M), (0, 0)))
    out = pl.pallas_call(
        functools.partial(_mm_bn_kernel, act=act),
        out_shape=jax.ShapeDtypeStruct((Mp, Cout), out_dtype),
        grid=(Mp // tm,),
        in_specs=[
            pl.BlockSpec((tm, Kp), lambda i: (i, 0)),    # im2col rows
            pl.BlockSpec((Kp, Cout), lambda i: (0, 0)),  # full weight matrix
            pl.BlockSpec((1, Cout), lambda i: (0, 0)),   # BN scale
            pl.BlockSpec((1, Cout), lambda i: (0, 0)),   # BN shift
        ],
        out_specs=pl.BlockSpec((tm, Cout), lambda i: (i, 0)),
        compiler_params=pltpu.CompilerParams(
            dimension_semantics=("parallel",),
            vmem_limit_bytes=VMEM_LIMIT),
    )(A.astype(jnp.bfloat16), B.astype(jnp.bfloat16),
      scale.reshape(1, Cout).astype(jnp.float32),
      shift.reshape(1, Cout).astype(jnp.float32))
    return out[:M].reshape(N, Ho, Wo, Cout)


def maxpool3x3_s2(x):
    # 3x3 / stride-2 / pad-1 max pool (lax.reduce_window; no 9x patch blow-up).
    return lax.reduce_window(
        x, jnp.array(-jnp.inf, x.dtype), lax.max,
        window_dimensions=(1, 3, 3, 1), window_strides=(1, 2, 2, 1),
        padding=((0, 0), (1, 1), (1, 1), (0, 0)))


# ---------------------------------------------------------------------------
# Fused UpsamplingNearest2d(2) + ConvTranspose2d(64->3,k7,s2,p3,op1) fold
# ---------------------------------------------------------------------------
# Per output phase r = oh % 4: list of ConvT kernel rows merged into the 3x3
# tap at input offset (-1, 0, +1) of the PRE-upsample activation.
_CT_TAPS = (
    ((5,), (3, 1), ()),      # r = 0
    ((6,), (4, 2), (0,)),    # r = 1
    ((),   (5, 3), (1,)),    # r = 2
    ((),   (6, 4), (2, 0)),  # r = 3
)


def fold_upsample_convtranspose_weights(w_pt, cout_pad=128):
    """Fold 2x nearest upsample + ConvTranspose2d(k7,s2,p3,op1) into one
    3x3 stride-1 zero-pad-1 conv whose packed output channel
    (r*4+s)*Cout + co holds out[4*qh+r, 4*qw+s, co].

    w_pt: (Cin, Cout, 7, 7) PyTorch ConvTranspose2d layout.
    Returns (9, Cin, cout_pad) per-tap weights (f32).
    """
    Cin, Cout = w_pt.shape[0], w_pt.shape[1]
    w = w_pt.astype(jnp.float32)
    taps = []
    for eh in range(3):
        for ew in range(3):
            cols = []
            for r in range(4):
                for s in range(4):
                    acc = jnp.zeros((Cin, Cout), jnp.float32)
                    for kh in _CT_TAPS[r][eh]:
                        for kw in _CT_TAPS[s][ew]:
                            acc = acc + w[:, :, kh, kw]
                    cols.append(acc)
            taps.append(jnp.concatenate(cols, axis=1))   # (Cin, 16*Cout)
    w_taps = jnp.stack(taps, axis=0)                     # (9, Cin, 48)
    if cout_pad > 16 * Cout:
        w_taps = jnp.pad(w_taps, ((0, 0), (0, 0), (0, cout_pad - 16 * Cout)))
    return w_taps


def unpack_subpixel(y, cout=3):
    """(N, H, W, >=16*cout) packed phases -> (N, 4H, 4W, cout)."""
    N, H, W, _ = y.shape
    y = y[..., :16 * cout].reshape(N, H, W, 4, 4, cout)
    y = jnp.transpose(y, (0, 1, 3, 2, 4, 5))
    return y.reshape(N, 4 * H, 4 * W, cout)


# ---------------------------------------------------------------------------
# f32 lax references (used only for numerical validation in __main__)
# ---------------------------------------------------------------------------
def _upsample_convtranspose_ref(x, w_pt):
    u = jnp.repeat(jnp.repeat(x, 2, axis=1), 2, axis=2)
    w = jnp.transpose(w_pt, (2, 3, 0, 1))[::-1, ::-1]          # (KH,KW,Cin,Cout)
    return lax.conv_general_dilated(
        u, w, window_strides=(1, 1), padding=((3, 4), (3, 4)),
        lhs_dilation=(2, 2), dimension_numbers=("NHWC", "HWIO", "NHWC"),
        precision=lax.Precision.HIGHEST)


def _folded_tail_ref(x, w_pt):
    w_taps = fold_upsample_convtranspose_weights(w_pt, cout_pad=48)
    N, H, W, Cin = x.shape
    xp = jnp.pad(x, ((0, 0), (1, 1), (1, 1), (0, 0)))
    acc = jnp.zeros((N, H, W, 48), jnp.float32)
    for t in range(9):
        di, dj = t // 3, t % 3
        acc = acc + jnp.einsum("nhwc,cd->nhwd", xp[:, di:di + H, dj:dj + W, :],
                               w_taps[t], precision=lax.Precision.HIGHEST)
    return unpack_subpixel(acc)


def _conv3x3_xla_ref(x, w, scale, shift, residual, pad_mode, act):
    mode = "reflect" if pad_mode == "reflect" else "constant"
    xp = jnp.pad(x, ((0, 0), (1, 1), (1, 1), (0, 0)), mode=mode)
    y = lax.conv_general_dilated(xp, w, (1, 1), "VALID",
                                 dimension_numbers=("NHWC", "HWIO", "NHWC"),
                                 precision=lax.Precision.HIGHEST)
    y = y * scale + shift
    if residual is not None:
        y = y + residual
    if act == "relu":
        y = jnp.maximum(y, 0.0)
    return y


# ---------------------------------------------------------------------------
# Parameters (deterministic synthetic init)
# ---------------------------------------------------------------------------
def init_params(key):
    keys = iter(jax.random.split(key, 80))

    def w(shape):
        return 0.05 * jax.random.normal(next(keys), shape, jnp.float32)

    def bn(c, eps=1e-5):  # inference-mode BatchNorm folded to scale/shift
        gamma = 1.0 + 0.05 * jax.random.normal(next(keys), (c,), jnp.float32)
        beta = 0.05 * jax.random.normal(next(keys), (c,), jnp.float32)
        mean = 0.05 * jax.random.normal(next(keys), (c,), jnp.float32)
        var = 1.0 + 0.05 * jnp.abs(jax.random.normal(next(keys), (c,), jnp.float32))
        scale = gamma / jnp.sqrt(var + eps)
        shift = beta - mean * scale
        return scale, shift

    P = {}
    # encoder = resnet18 children[:5] = conv1, bn1, relu, maxpool, layer1
    P["conv1_w"] = w((7, 7, 3, 64))
    P["bn1"] = bn(64)
    for b in range(2):  # layer1: two BasicBlock(64), identity shortcut
        P[f"l1_{b}_w1"] = w((3, 3, 64, 64)); P[f"l1_{b}_bn1"] = bn(64)
        P[f"l1_{b}_w2"] = w((3, 3, 64, 64)); P[f"l1_{b}_bn2"] = bn(64)
    # decoder: 3x ResnetBlock(64) (reflect-pad conv-bn-relu, reflect-pad conv-bn, +skip)
    for b in range(3):
        P[f"d{b}_w1"] = w((3, 3, 64, 64)); P[f"d{b}_bn1"] = bn(64)
        P[f"d{b}_w2"] = w((3, 3, 64, 64)); P[f"d{b}_bn2"] = bn(64)
    # ConvTranspose2d(64, 3, k=7, s=2, p=3, output_padding=1, bias=False)
    P["ct_w"] = w((64, 3, 7, 7))  # PyTorch ConvTranspose layout (Cin, Cout, KH, KW)
    return P


# ---------------------------------------------------------------------------
# Full forward pass (mirrors conv_generator.forward)
# ---------------------------------------------------------------------------
def conv_generator_forward(x_nchw, P):
    x = jnp.transpose(x_nchw, (0, 2, 3, 1)).astype(jnp.bfloat16)  # NCHW -> NHWC

    # ---- encoder: conv1/bn/relu, maxpool, layer1 ----
    s, c = P["bn1"]
    x = conv2d_im2col_bn(x, P["conv1_w"], stride=2, pad=3,
                         scale=s, shift=c, act="relu")
    x = maxpool3x3_s2(x)
    for b in range(2):  # resnet18 layer1 BasicBlocks
        idt = x
        s1, c1 = P[f"l1_{b}_bn1"]
        s2, c2 = P[f"l1_{b}_bn2"]
        y = conv3x3_bn(x, P[f"l1_{b}_w1"], s1, c1, act="relu")
        x = conv3x3_bn(y, P[f"l1_{b}_w2"], s2, c2, residual=idt, act="relu")

    # ---- decoder ----
    for b in range(3):  # ResnetBlock(64)
        idt = x
        s1, c1 = P[f"d{b}_bn1"]
        s2, c2 = P[f"d{b}_bn2"]
        y = conv3x3_bn(x, P[f"d{b}_w1"], s1, c1, pad_mode="reflect", act="relu")
        x = conv3x3_bn(y, P[f"d{b}_w2"], s2, c2, pad_mode="reflect",
                       residual=idt, act="none")

    # fused UpsamplingNearest2d(2) + ConvTranspose2d + Tanh (single Pallas conv)
    w_taps = fold_upsample_convtranspose_weights(P["ct_w"], cout_pad=128)
    Cp = w_taps.shape[-1]
    y = conv3x3_taps(x, w_taps, jnp.ones((Cp,), jnp.float32),
                     jnp.zeros((Cp,), jnp.float32), act="tanh")
    out = unpack_subpixel(y)                                   # (N, 4H, 4W, 3)
    return jnp.transpose(out, (0, 3, 1, 2)).astype(jnp.float32)  # back to NCHW


if __name__ == "__main__":
    key = jax.random.PRNGKey(0)
    kx, kp, kv = jax.random.split(key, 3)
    # small stand-in for a 224x224 RGB image batch
    x = jax.random.normal(kx, (2, 3, 32, 32), jnp.float32)  # NCHW like PyTorch
    params = init_params(kp)

    kv1, kv2, kv3, kv4 = jax.random.split(kv, 4)

    # --- validate the upsample+ConvTranspose fold (pure f32 math check) ---
    xt = jax.random.normal(kv1, (2, 8, 8, 64), jnp.float32)
    ref_t = _upsample_convtranspose_ref(xt, params["ct_w"])
    fold_t = _folded_tail_ref(xt, params["ct_w"])
    err_t = float(jnp.max(jnp.abs(ref_t - fold_t)))
    assert err_t < 1e-3, err_t

    # --- validate the Pallas direct-conv kernel (bf16-rounded inputs) ---
    xv = jax.random.normal(kv1, (2, 8, 8, 64), jnp.float32).astype(jnp.bfloat16)
    rv = jax.random.normal(kv2, (2, 8, 8, 64), jnp.float32).astype(jnp.bfloat16)
    wv = (0.05 * jax.random.normal(kv3, (3, 3, 64, 64), jnp.float32)
          ).astype(jnp.bfloat16).astype(jnp.float32)
    sv = 1.0 + 0.1 * jax.random.normal(kv4, (64,), jnp.float32)
    cv = 0.1 * jnp.ones((64,), jnp.float32)
    for pm, act in (("constant", "relu"), ("reflect", "none")):
        got = conv3x3_bn(xv, wv, sv, cv, pad_mode=pm, residual=rv,
                         act=act).astype(jnp.float32)
        want = _conv3x3_xla_ref(xv.astype(jnp.float32), wv, sv, cv,
                                rv.astype(jnp.float32), pm, act)
        err = float(jnp.max(jnp.abs(got - want)))
        assert err < 0.06, (pm, act, err)

    # --- full forward pass ---
    out = jax.jit(conv_generator_forward)(x, params)
    out = jax.block_until_ready(out)

    assert out.shape == (2, 3, 32, 32), out.shape
    assert bool(jnp.all(jnp.isfinite(out)))
    assert bool(jnp.all(jnp.abs(out) <= 1.0 + 1e-6))  # Tanh output range
    print("KERNEL_OK")
</pallas_src>

<mosaic_0001>
module attributes {stable_mosaic.version = 11 : i64} {
  func.func @_conv3x3_res_kernel(%arg0: i32, %arg1: i32, %arg2: memref<1x8x8x64xbf16, #tpu.memory_space<vmem>>, %arg3: memref<9x64x64xbf16, #tpu.memory_space<vmem>>, %arg4: memref<1x64xf32, #tpu.memory_space<vmem>>, %arg5: memref<1x64xf32, #tpu.memory_space<vmem>>, %arg6: memref<1x4x8x64xbf16, #tpu.memory_space<vmem>>, %arg7: memref<1x4x8x64xbf16, #tpu.memory_space<vmem>>) attributes {dimension_semantics = [#tpu.dimension_semantics<parallel>, #tpu.dimension_semantics<parallel>], iteration_bounds = array<i64: 2, 2>, scalar_prefetch = 0 : i64, scratch_operands = 0 : i64, tpu.core_type = #tpu.core_type<tc>, window_params = [{transform_indices = @transform_0, window_bounds = array<i64: 1, 8, 8, 64>}, {pipeline_mode = #tpu.pipeline_mode<synchronous>, transform_indices = @transform_1, window_bounds = array<i64: 9, 64, 64>}, {pipeline_mode = #tpu.pipeline_mode<synchronous>, transform_indices = @transform_2, window_bounds = array<i64: 1, 64>}, {pipeline_mode = #tpu.pipeline_mode<synchronous>, transform_indices = @transform_3, window_bounds = array<i64: 1, 64>}, {transform_indices = @transform_4, window_bounds = array<i64: 1, 4, 8, 64>}, {transform_indices = @transform_5, window_bounds = array<i64: 1, 4, 8, 64>}]} {
    %c4_i32 = arith.constant 4 : i32
    %0 = arith.muli %arg1, %c4_i32 : i32
    %c0 = arith.constant 0 : index
    %1 = arith.index_cast %0 : i32 to index
    %c0_0 = arith.constant 0 : index
    %c0_1 = arith.constant 0 : index
    %2 = vector.load %arg2[%c0, %1, %c0_0, %c0_1] : memref<1x8x8x64xbf16, #tpu.memory_space<vmem>>, vector<1x4x8x64xbf16>
    %3 = vector.shape_cast %2 : vector<1x4x8x64xbf16> to vector<4x8x64xbf16>
    %c1_i32 = arith.constant 1 : i32
    %4 = arith.subi %0, %c1_i32 : i32
    %c0_i32 = arith.constant 0 : i32
    %5 = arith.maxsi %4, %c0_i32 : i32
    %c0_2 = arith.constant 0 : index
    %6 = arith.index_cast %5 : i32 to index
    %c0_3 = arith.constant 0 : index
    %c0_4 = arith.constant 0 : index
    %7 = vector.load %arg2[%c0_2, %6, %c0_3, %c0_4] : memref<1x8x8x64xbf16, #tpu.memory_space<vmem>>, vector<1x1x8x64xbf16>
    %8 = vector.shape_cast %7 : vector<1x1x8x64xbf16> to vector<1x8x64xbf16>
    %c4_i32_5 = arith.constant 4 : i32
    %9 = arith.addi %0, %c4_i32_5 : i32
    %c7_i32 = arith.constant 7 : i32
    %10 = arith.minsi %9, %c7_i32 : i32
    %c0_6 = arith.constant 0 : index
    %11 = arith.index_cast %10 : i32 to index
    %c0_7 = arith.constant 0 : index
    %c0_8 = arith.constant 0 : index
    %12 = vector.load %arg2[%c0_6, %11, %c0_7, %c0_8] : memref<1x8x8x64xbf16, #tpu.memory_space<vmem>>, vector<1x1x8x64xbf16>
    %13 = vector.shape_cast %12 : vector<1x1x8x64xbf16> to vector<1x8x64xbf16>
    %cst = arith.constant 0.000000e+00 : bf16
    %14 = vector.broadcast %cst : bf16 to vector<1x8x64xbf16>
    %c0_i32_9 = arith.constant 0 : i32
    %15 = arith.cmpi eq, %0, %c0_i32_9 : i32
    %16 = arith.select %15, %14, %8 : vector<1x8x64xbf16>
    %c4_i32_10 = arith.constant 4 : i32
    %17 = arith.addi %0, %c4_i32_10 : i32
    %c8_i32 = arith.constant 8 : i32
    %18 = arith.cmpi eq, %17, %c8_i32 : i32
    %19 = arith.select %18, %14, %13 : vector<1x8x64xbf16>
    %20 = tpu.concatenate %16, %3, %19 in 0 : vector<1x8x64xbf16>, vector<4x8x64xbf16>, vector<1x8x64xbf16> -> vector<6x8x64xbf16>
    %cst_11 = arith.constant 0.000000e+00 : bf16
    %21 = vector.broadcast %cst_11 : bf16 to vector<6x1x64xbf16>
    %22 = tpu.concatenate %21, %20, %21 in 1 : vector<6x1x64xbf16>, vector<6x8x64xbf16>, vector<6x1x64xbf16> -> vector<6x10x64xbf16>
    %cst_12 = arith.constant 0.000000e+00 : f32
    %23 = vector.broadcast %cst_12 : f32 to vector<32x64xf32>
    %24 = vector.extract_strided_slice %22 {offsets = [0, 0, 0], sizes = [4, 8, 64], strides = [1, 1, 1]} : vector<6x10x64xbf16> to vector<4x8x64xbf16>
    %25 = vector.shape_cast %24 : vector<4x8x64xbf16> to vector<32x64xbf16>
    %c0_13 = arith.constant 0 : index
    %c0_14 = arith.constant 0 : index
    %c0_15 = arith.constant 0 : index
    %26 = vector.load %arg3[%c0_13, %c0_14, %c0_15] : memref<9x64x64xbf16, #tpu.memory_space<vmem>>, vector<1x64x64xbf16>
    %27 = vector.shape_cast %26 : vector<1x64x64xbf16> to vector<64x64xbf16>
    %cst_16 = arith.constant dense<0.000000e+00> : vector<32x64xf32>
    %28 = tpu.matmul %25, %27, %cst_16 {dimension_numbers = #tpu.dot_dimension_numbers<[1], [0], [0], [1], [0, 0, 1, 1], [], []>} : vector<32x64xbf16>, vector<64x64xbf16>, vector<32x64xf32> -> vector<32x64xf32>
    %29 = arith.addf %23, %28 : vector<32x64xf32>
    %30 = vector.extract_strided_slice %22 {offsets = [0, 1, 0], sizes = [4, 8, 64], strides = [1, 1, 1]} : vector<6x10x64xbf16> to vector<4x8x64xbf16>
    %31 = vector.shape_cast %30 : vector<4x8x64xbf16> to vector<32x64xbf16>
    %c1 = arith.constant 1 : index
    %c0_17 = arith.constant 0 : index
    %c0_18 = arith.constant 0 : index
    %32 = vector.load %arg3[%c1, %c0_17, %c0_18] : memref<9x64x64xbf16, #tpu.memory_space<vmem>>, vector<1x64x64xbf16>
    %33 = vector.shape_cast %32 : vector<1x64x64xbf16> to vector<64x64xbf16>
    %cst_19 = arith.constant dense<0.000000e+00> : vector<32x64xf32>
    %34 = tpu.matmul %31, %33, %cst_19 {dimension_numbers = #tpu.dot_dimension_numbers<[1], [0], [0], [1], [0, 0, 1, 1], [], []>} : vector<32x64xbf16>, vector<64x64xbf16>, vector<32x64xf32> -> vector<32x64xf32>
    %35 = arith.addf %29, %34 : vector<32x64xf32>
    %36 = vector.extract_strided_slice %22 {offsets = [0, 2, 0], sizes = [4, 8, 64], strides = [1, 1, 1]} : vector<6x10x64xbf16> to vector<4x8x64xbf16>
    %37 = vector.shape_cast %36 : vector<4x8x64xbf16> to vector<32x64xbf16>
    %c2 = arith.constant 2 : index
    %c0_20 = arith.constant 0 : index
    %c0_21 = arith.constant 0 : index
    %38 = vector.load %arg3[%c2, %c0_20, %c0_21] : memref<9x64x64xbf16, #tpu.memory_space<vmem>>, vector<1x64x64xbf16>
    %39 = vector.shape_cast %38 : vector<1x64x64xbf16> to vector<64x64xbf16>
    %cst_22 = arith.constant dense<0.000000e+00> : vector<32x64xf32>
    %40 = tpu.matmul %37, %39, %cst_22 {dimension_numbers = #tpu.dot_dimension_numbers<[1], [0], [0], [1], [0, 0, 1, 1], [], []>} : vector<32x64xbf16>, vector<64x64xbf16>, vector<32x64xf32> -> vector<32x64xf32>
    %41 = arith.addf %35, %40 : vector<32x64xf32>
    %42 = vector.extract_strided_slice %22 {offsets = [1, 0, 0], sizes = [4, 8, 64], strides = [1, 1, 1]} : vector<6x10x64xbf16> to vector<4x8x64xbf16>
    %43 = vector.shape_cast %42 : vector<4x8x64xbf16> to vector<32x64xbf16>
    %c3 = arith.constant 3 : index
    %c0_23 = arith.constant 0 : index
    %c0_24 = arith.constant 0 : index
    %44 = vector.load %arg3[%c3, %c0_23, %c0_24] : memref<9x64x64xbf16, #tpu.memory_space<vmem>>, vector<1x64x64xbf16>
    %45 = vector.shape_cast %44 : vector<1x64x64xbf16> to vector<64x64xbf16>
    %cst_25 = arith.constant dense<0.000000e+00> : vector<32x64xf32>
    %46 = tpu.matmul %43, %45, %cst_25 {dimension_numbers = #tpu.dot_dimension_numbers<[1], [0], [0], [1], [0, 0, 1, 1], [], []>} : vector<32x64xbf16>, vector<64x64xbf16>, vector<32x64xf32> -> vector<32x64xf32>
    %47 = arith.addf %41, %46 : vector<32x64xf32>
    %48 = vector.extract_strided_slice %22 {offsets = [1, 1, 0], sizes = [4, 8, 64], strides = [1, 1, 1]} : vector<6x10x64xbf16> to vector<4x8x64xbf16>
    %49 = vector.shape_cast %48 : vector<4x8x64xbf16> to vector<32x64xbf16>
    %c4 = arith.constant 4 : index
    %c0_26 = arith.constant 0 : index
    %c0_27 = arith.constant 0 : index
    %50 = vector.load %arg3[%c4, %c0_26, %c0_27] : memref<9x64x64xbf16, #tpu.memory_space<vmem>>, vector<1x64x64xbf16>
    %51 = vector.shape_cast %50 : vector<1x64x64xbf16> to vector<64x64xbf16>
    %cst_28 = arith.constant dense<0.000000e+00> : vector<32x64xf32>
    %52 = tpu.matmul %49, %51, %cst_28 {dimension_numbers = #tpu.dot_dimension_numbers<[1], [0], [0], [1], [0, 0, 1, 1], [], []>} : vector<32x64xbf16>, vector<64x64xbf16>, vector<32x64xf32> -> vector<32x64xf32>
    %53 = arith.addf %47, %52 : vector<32x64xf32>
    %54 = vector.extract_strided_slice %22 {offsets = [1, 2, 0], sizes = [4, 8, 64], strides = [1, 1, 1]} : vector<6x10x64xbf16> to vector<4x8x64xbf16>
    %55 = vector.shape_cast %54 : vector<4x8x64xbf16> to vector<32x64xbf16>
    %c5 = arith.constant 5 : index
    %c0_29 = arith.constant 0 : index
    %c0_30 = arith.constant 0 : index
    %56 = vector.load %arg3[%c5, %c0_29, %c0_30] : memref<9x64x64xbf16, #tpu.memory_space<vmem>>, vector<1x64x64xbf16>
    %57 = vector.shape_cast %56 : vector<1x64x64xbf16> to vector<64x64xbf16>
    %cst_31 = arith.constant dense<0.000000e+00> : vector<32x64xf32>
    %58 = tpu.matmul %55, %57, %cst_31 {dimension_numbers = #tpu.dot_dimension_numbers<[1], [0], [0], [1], [0, 0, 1, 1], [], []>} : vector<32x64xbf16>, vector<64x64xbf16>, vector<32x64xf32> -> vector<32x64xf32>
    %59 = arith.addf %53, %58 : vector<32x64xf32>
    %60 = vector.extract_strided_slice %22 {offsets = [2, 0, 0], sizes = [4, 8, 64], strides = [1, 1, 1]} : vector<6x10x64xbf16> to vector<4x8x64xbf16>
    %61 = vector.shape_cast %60 : vector<4x8x64xbf16> to vector<32x64xbf16>
    %c6 = arith.constant 6 : index
    %c0_32 = arith.constant 0 : index
    %c0_33 = arith.constant 0 : index
    %62 = vector.load %arg3[%c6, %c0_32, %c0_33] : memref<9x64x64xbf16, #tpu.memory_space<vmem>>, vector<1x64x64xbf16>
    %63 = vector.shape_cast %62 : vector<1x64x64xbf16> to vector<64x64xbf16>
    %cst_34 = arith.constant dense<0.000000e+00> : vector<32x64xf32>
    %64 = tpu.matmul %61, %63, %cst_34 {dimension_numbers = #tpu.dot_dimension_numbers<[1], [0], [0], [1], [0, 0, 1, 1], [], []>} : vector<32x64xbf16>, vector<64x64xbf16>, vector<32x64xf32> -> vector<32x64xf32>
    %65 = arith.addf %59, %64 : vector<32x64xf32>
    %66 = vector.extract_strided_slice %22 {offsets = [2, 1, 0], sizes = [4, 8, 64], strides = [1, 1, 1]} : vector<6x10x64xbf16> to vector<4x8x64xbf16>
    %67 = vector.shape_cast %66 : vector<4x8x64xbf16> to vector<32x64xbf16>
    %c7 = arith.constant 7 : index
    %c0_35 = arith.constant 0 : index
    %c0_36 = arith.constant 0 : index
    %68 = vector.load %arg3[%c7, %c0_35, %c0_36] : memref<9x64x64xbf16, #tpu.memory_space<vmem>>, vector<1x64x64xbf16>
    %69 = vector.shape_cast %68 : vector<1x64x64xbf16> to vector<64x64xbf16>
    %cst_37 = arith.constant dense<0.000000e+00> : vector<32x64xf32>
    %70 = tpu.matmul %67, %69, %cst_37 {dimension_numbers = #tpu.dot_dimension_numbers<[1], [0], [0], [1], [0, 0, 1, 1], [], []>} : vector<32x64xbf16>, vector<64x64xbf16>, vector<32x64xf32> -> vector<32x64xf32>
    %71 = arith.addf %65, %70 : vector<32x64xf32>
    %72 = vector.extract_strided_slice %22 {offsets = [2, 2, 0], sizes = [4, 8, 64], strides = [1, 1, 1]} : vector<6x10x64xbf16> to vector<4x8x64xbf16>
    %73 = vector.shape_cast %72 : vector<4x8x64xbf16> to vector<32x64xbf16>
    %c8 = arith.constant 8 : index
    %c0_38 = arith.constant 0 : index
    %c0_39 = arith.constant 0 : index
    %74 = vector.load %arg3[%c8, %c0_38, %c0_39] : memref<9x64x64xbf16, #tpu.memory_space<vmem>>, vector<1x64x64xbf16>
    %75 = vector.shape_cast %74 : vector<1x64x64xbf16> to vector<64x64xbf16>
    %cst_40 = arith.constant dense<0.000000e+00> : vector<32x64xf32>
    %76 = tpu.matmul %73, %75, %cst_40 {dimension_numbers = #tpu.dot_dimension_numbers<[1], [0], [0], [1], [0, 0, 1, 1], [], []>} : vector<32x64xbf16>, vector<64x64xbf16>, vector<32x64xf32> -> vector<32x64xf32>
    %77 = arith.addf %71, %76 : vector<32x64xf32>
    %c0_41 = arith.constant 0 : index
    %c0_42 = arith.constant 0 : index
    %78 = vector.load %arg4[%c0_41, %c0_42] : memref<1x64xf32, #tpu.memory_space<vmem>>, vector<1x64xf32>
    %79 = vector.broadcast %78 : vector<1x64xf32> to vector<32x64xf32>
    %80 = arith.mulf %77, %79 : vector<32x64xf32>
    %c0_43 = arith.constant 0 : index
    %c0_44 = arith.constant 0 : index
    %81 = vector.load %arg5[%c0_43, %c0_44] : memref<1x64xf32, #tpu.memory_space<vmem>>, vector<1x64xf32>
    %82 = vector.broadcast %81 : vector<1x64xf32> to vector<32x64xf32>
    %83 = arith.addf %80, %82 : vector<32x64xf32>
    %c0_45 = arith.constant 0 : index
    %c0_46 = arith.constant 0 : index
    %c0_47 = arith.constant 0 : index
    %c0_48 = arith.constant 0 : index
    %84 = vector.load %arg6[%c0_45, %c0_46, %c0_47, %c0_48] : memref<1x4x8x64xbf16, #tpu.memory_space<vmem>>, vector<1x4x8x64xbf16>
    %85 = vector.shape_cast %84 : vector<1x4x8x64xbf16> to vector<4x8x64xbf16>
    %86 = arith.extf %85 : vector<4x8x64xbf16> to vector<4x8x64xf32>
    %87 = vector.shape_cast %86 : vector<4x8x64xf32> to vector<32x64xf32>
    %88 = arith.addf %83, %87 : vector<32x64xf32>
    %cst_49 = arith.constant 0.000000e+00 : f32
    %89 = vector.broadcast %cst_49 : f32 to vector<32x64xf32>
    %90 = arith.maximumf %88, %89 : vector<32x64xf32>
    %91 = vector.shape_cast %90 : vector<32x64xf32> to vector<1x4x8x64xf32>
    %92 = arith.truncf %91 : vector<1x4x8x64xf32> to vector<1x4x8x64xbf16>
    %c0_50 = arith.constant 0 : index
    %c0_51 = arith.constant 0 : index
    %c0_52 = arith.constant 0 : index
    %c0_53 = arith.constant 0 : index
    %93 = vector.load %arg7[%c0_50, %c0_51, %c0_52, %c0_53] : memref<1x4x8x64xbf16, #tpu.memory_space<vmem>>, vector<1x4x8x64xbf16>
    tpu.vector_store %arg7[%c0_50, %c0_51, %c0_52, %c0_53], %92 {strides = array<i32>} : memref<1x4x8x64xbf16, #tpu.memory_space<vmem>>, vector<1x4x8x64xbf16>,
    return
  }
  func.func @transform_0(%arg0: i32, %arg1: i32) -> (i32, i32, i32, i32) {
    %c0_i32 = arith.constant 0 : i32
    %c0_i32_0 = arith.constant 0 : i32
    %c0_i32_1 = arith.constant 0 : i32
    %c0_i32_2 = arith.constant 0 : i32
    return %arg0, %c0_i32, %c0_i32_0, %c0_i32_1 : i32, i32, i32, i32
  }
  func.func @transform_1(%arg0: i32, %arg1: i32) -> (i32, i32, i32) {
    %c0_i32 = arith.constant 0 : i32
    %c0_i32_0 = arith.constant 0 : i32
    %c0_i32_1 = arith.constant 0 : i32
    %c0_i32_2 = arith.constant 0 : i32
    return %c0_i32, %c0_i32_0, %c0_i32_1 : i32, i32, i32
  }
  func.func @transform_2(%arg0: i32, %arg1: i32) -> (i32, i32) {
    %c0_i32 = arith.constant 0 : i32
    %c0_i32_0 = arith.constant 0 : i32
    %c0_i32_1 = arith.constant 0 : i32
    return %c0_i32, %c0_i32_0 : i32, i32
  }
  func.func @transform_3(%arg0: i32, %arg1: i32) -> (i32, i32) {
    %c0_i32 = arith.constant 0 : i32
    %c0_i32_0 = arith.constant 0 : i32
    %c0_i32_1 = arith.constant 0 : i32
    return %c0_i32, %c0_i32_0 : i32, i32
  }
  func.func @transform_4(%arg0: i32, %arg1: i32) -> (i32, i32, i32, i32) {
    %c0_i32 = arith.constant 0 : i32
    %c0_i32_0 = arith.constant 0 : i32
    %c0_i32_1 = arith.constant 0 : i32
    return %arg0, %arg1, %c0_i32, %c0_i32_0 : i32, i32, i32, i32
  }
  func.func @transform_5(%arg0: i32, %arg1: i32) -> (i32, i32, i32, i32) {
    %c0_i32 = arith.constant 0 : i32
    %c0_i32_0 = arith.constant 0 : i32
    %c0_i32_1 = arith.constant 0 : i32
    return %arg0, %arg1, %c0_i32, %c0_i32_0 : i32, i32, i32, i32
  }
}

</mosaic_0001>

<bundles_post_ra>
// kernel: tpu_custom_call.1
= control target key start
LH: loop header
LB: loop body
LE: loop exit
PB: predicated region body
PF: predicated region fallthrough
CT: control target
= control target key end

     0   :  { %s2993_s0 = inlined_call_operand.hbm [shape: bf16[2,8,8,64], index: 0, kind: input, shape index: {}]   ;;  %s2994_s1 = inlined_call_operand.hbm [shape: bf16[9,64,64], index: 1, kind: input, shape index: {}]   ;;  %s2995_s2 = inlined_call_operand.vmem [shape: f32[1,64], index: 2, kind: input, shape index: {}]   ;;  %s2996_s3 = inlined_call_operand.vmem [shape: f32[1,64], index: 3, kind: input, shape index: {}]   ;;  %s2997_s4 = inlined_call_operand.hbm [shape: bf16[2,8,8,64], index: 4, kind: input, shape index: {}]   ;;  %s2998_s5 = inlined_call_operand.hbm [shape: bf16[2,8,8,64], index: 5, kind: output, shape index: {}]  }
   0x1   :  { %3024 = sst [smem:[#allocation23_spill]] %s2993_s0 }
   0x2   :  { %3025 = sst [smem:[#allocation24_spill]] %s2994_s1 }
   0x3   :  { %3026 = sst [smem:[#allocation25_spill]] %s2995_s2 }
   0x4   :  { %3027 = sst [smem:[#allocation26_spill]] %s2996_s3 }
   0x5   :  { %3028 = sst [smem:[#allocation27_spill]] %s2998_s5 }
   0x6   :  { %10 = vsyncpa [#allocation3], 0 }
   0x7   :  { %12 = vsyncpa [#allocation3 + $0x1], 0 }
   0x8   :  { %13 = vsyncpa [#allocation6], 0 }
   0x9   :  { %14 = vsyncpa [#allocation4], 0 }
   0xa   :  { %16 = vsyncpa [#allocation4 + $0x1], 0  ;;  %s2348_s18 = smov 0   ;;  %s2350_s19 = smov 0  }
   0xb   :  { %s2352_s20 = smov 0   ;;  %s2354_s21 = smov 0  }
   0xc   :  { %s2356_s22 = smov 0   ;;  %s2358_s23 = smov 0  }
   0xd   :  { %s2360_s24 = smov 0   ;;  %s2362_s25 = smov 0  }
   0xe   :  { %s2364_s26 = smov 0   ;;  %s2366_s27 = smov 0  }
   0xf   :  { %s2368_s28 = smov 0  }
  0x10 LB: > { %3029 = sst [smem:[#allocation13_spill]] %s2268_s18  ;;  %p48_p0 = scmp.ne.s32.totalorder %s2288_s23, %s2284_s22  ;;  %s2308_s28 = sphi %s2368_s28, %s22_s28   ;;  %s2304_s27 = sphi %s2366_s27, %s3101_s27   ;;  %s2300_s26 = sphi %s2364_s26, %s3092_s26   ;;  %s2296_s25 = sphi %s2362_s25, %s3100_s25   ;;  %s2292_s24 = sphi %s2360_s24, %s3091_s24   ;;  %s2288_s23 = sphi %s2358_s23, %s3099_s23   ;;  %s2284_s22 = sphi %s2356_s22, %s3098_s22   ;;  %s2280_s21 = sphi %s2354_s21, %s3097_s21   ;;  %s2276_s20 = sphi %s2352_s20, %s3096_s20   ;;  %s2272_s19 = sphi %s2350_s19, %s3095_s19   ;;  %s2268_s18 = sphi %s2348_s18, %s3094_s18  }
  0x11   : > { %3030 = sst [smem:[#allocation14_spill]] %s2272_s19  ;;  %p3007_p1 = scmp.eq.s32.totalorder %s2308_s28, 0 }
  0x12   : > { %3031 = sst [smem:[#allocation15_spill]] %s2292_s24  ;;  %p2999_p3 = scmp.lt.s32.totalorder %s2308_s28, 4 }
  0x13   : > { %3032 = sst [smem:[#allocation16_spill]] %s2296_s25  ;;  %p50_p2 = por %p3007_p1, %p48_p0 }
  0x14   : > { %3033 = sst [smem:[#allocation17_spill]] %s2300_s26  ;;  %s216_s6 = sand.u32 1, %s2308_s28  }
  0x15   : > { %s218_s7 = sand.u32 1, %s2288_s23   ;;  %s1723_s9 = sshll.u32 %s2304_s27, 9 }
  0x16   : > { %s1605_s8 = sshll.u32 %s218_s7, 5  ;;  %s3034_s0 = sld [smem:[#allocation23_spill]] }
  0x17   : > { %s220_s13 = scalar_lea.vmem [#allocation2], %s1605_s8  ;;  %p2421_p4 = pnand %p2999_p3, %p50_p2 }
  0x18   : > { %s227_s14 = sshll.u32 %s220_s13, 4  ;;  %s2427_s16 = scalar_lea.sflag [#allocation3], %s216_s6  ;;  %s2425_s14 = int_to_ptr.vmem [resolvable:$true] %s227_s14 }
  0x19   : > { %p2092_p6 = pneg %p2421_p4 }
  0x1c   : > { %s2417_s12 = scalar_lea.hbm %s3034_s0, %s1723_s9  ;;  %s2095_s9 = scalar_lea.hbm %s3034_s0, 1024 }
  0x1d   : > { %s2090_s17 = scalar_lea.hbm %s2417_s12, 512  ;;  %p2096_p9 = scmp.lt.u32.totalorder %s2417_s12, %s3034_s0 }
  0x1e   : > { %p2091_p5 = scmp.ne.s32.totalorder %s2417_s12, %s2090_s17  ;;  %p2097_p10 = scmp.lt.u32.totalorder %s2095_s9, %s2090_s17 }
  0x1f   : > { %p2099_p12 = scmp.lt.u32.totalorder %s2090_s17, %s2417_s12 }
  0x20   : > { %p2093_p7 = pnand %p2092_p6, %p2091_p5  ;;  %p2098_p11 = por %p2097_p10, %p2096_p9 }
  0x22   : > { %p2094_p8 = pneg %p2093_p7  ;;  %p2100_p13 = por %p2099_p12, %p2098_p11 }
  0x24   : > { %p2101_p0 = pnand %p2100_p13, %p2094_p8 }
  0x26   : > { %2104 = shalt.err (!%p2101_p0)
}
  0x27   : > { %s2105_s6 = scalar_lea.vmem %s2425_s14, 512  ;;  %s2310_s13 = smov [#allocation2]  }
  0x28   : > { %p2106_p2 = scmp.ne.s32.totalorder %s2425_s14, %s2105_s6  ;;  %s2110_s7 = sshll.u32 %s2310_s13, 4  ;;  %s2111_s7 = int_to_ptr.vmem [resolvable:$false] %s2110_s7 }
  0x29   : > { %s2112_s8 = scalar_lea.vmem %s2111_s7, 1024  ;;  %p2113_p3 = scmp.lt.s32.totalorder %s2425_s14, %s2111_s7 }
  0x2a   : > { %p2108_p5 = pnand %p2106_p2, %p2092_p6  ;;  %p2114_p9 = scmp.lt.s32.totalorder %s2112_s8, %s2105_s6 }
  0x2c   : > { %p2109_p7 = pneg %p2108_p5  ;;  %p2115_p10 = por %p2114_p9, %p2113_p3 }
  0x2e   : > { %p2116_p11 = pnand %p2115_p10, %p2109_p7 }
  0x30   : > { %2119 = shalt.err (!%p2116_p11)
}
  0x31   : > { %s3000_s17 = smov 64   ;;  %s3002_s9 = smov 4  }
  0x32   : > { %1945 = dma.hbm_to_vmem [thread:$0]  (!%p2421_p4), %s2417_s12, 512, %s2425_s14, %s2427_s16, %s3000_s17, %s3000_s17, %s3002_s9  }
  0x33   : > { %s2459_s10 = sadd.s32 4294967295, %s2308_s28   ;;  %s1601_s11 = sadd.s32 4294967294, %s2308_s28  }
  0x34   : > { %p54_p3 = scmp.ne.s32.totalorder %s2284_s22, %s2280_s21  ;;  %p3006_p6 = scmp.eq.s32.totalorder %s2459_s10, 0 }
  0x35   : > { %p145_p8 = scmp.ne.s32.totalorder %s2272_s19, %s2268_s18  ;;  %p177_p4 = scmp.eq.s32.totalorder %s1601_s11, 3 }
  0x36   : > { %p2470_p13 = por %p3006_p6, %p54_p3  ;;  %p1602_p2 = scmp.ge.s32.totalorder %s2308_s28, 1 }
  0x37   : > { %p2476_p0 = por %p145_p8, %p3006_p6  ;;  %p2481_p5 = por %p177_p4, %p145_p8 }
  0x38   : > { %s3036_s15 = scalar_select %p2470_p13, 1, 0 }
  0x39   : > { %s3038_s12 = scalar_select %p2476_p0, 1, 0 }
  0x3a   : > { %3037 = sst [smem:[#allocation18_spill]] %s3036_s15  ;;  %p184_p7 = scmp.lt.s32.totalorder %s2308_s28, 5 }
  0x3b   : > { %3039 = sst [smem:[#allocation19_spill]] %s3038_s12  ;;  %s2313_s6 = smov [#allocation5]  }
  0x3c   : > { %s3040_s21 = scalar_select %p2481_p5, 1, 0 }
  0x3d   : > { %p2486_p9 = pnand %p1602_p2, %p184_p7  ;;  %s196_s13 = sshll.u32 %s2313_s6, 4  ;;  %s197_s13 = int_to_ptr.vmem [resolvable:$true] %s196_s13 }
  0x3e   : > { %3041 = sst [smem:[#allocation20_spill]] %s3040_s21  ;;  %s31_s8 = sadd.s32 1, %s2300_s26 }
  0x3f   : > { %s3042_s14 = scalar_select %p2486_p9, 1, 0 }
  0x40   : > { %p1938_p10 = pneg %p2486_p9  ;;  %p2499_p3 = scmp.ge.s32.totalorder %s31_s8, 2 }
  0x41   : > { %s3045_s1 = sld [smem:[#allocation24_spill]] }
  0x42   : > { %p2494_p11 = pnand %p1938_p10, %p3006_p6 }
  0x43   : > { %s3044_s11 = scalar_select %p2499_p3, 1, 0 }
  0x44   : > { %p2122_p2 = pneg %p2494_p11 }
  0x47   : > { %s2120_s6 = scalar_lea.hbm %s3045_s1, 4608 }
  0x48   : > { %p2121_p4 = scmp.ne.s32.totalorder %s3045_s1, %s2120_s6  ;;  %p2127_p6 = scmp.lt.u32.totalorder %s2120_s6, %s3045_s1 }
  0x4a   : > { %p2123_p7 = pnand %p2122_p2, %p2121_p4 }
  0x4c   : > { %p2124_p10 = pneg %p2123_p7 }
  0x4e   : > { %p2129_p12 = pnand %p2127_p6, %p2124_p10 }
  0x50   : > { %2132 = shalt.err (!%p2129_p12)
}
  0x51   : > { %s2133_s30 = scalar_lea.vmem %s197_s13, 4608  ;;  %p2141_p0 = scmp.lt.s32.totalorder %s197_s13, %s197_s13 }
  0x52   : > { %p2134_p8 = scmp.ne.s32.totalorder %s197_s13, %s2133_s30  ;;  %p2142_p13 = scmp.lt.s32.totalorder %s2133_s30, %s2133_s30 }
  0x54   : > { %p2136_p1 = pnand %p2134_p8, %p2122_p2  ;;  %p2143_p9 = por %p2142_p13, %p2141_p0 }
  0x56   : > { %p2137_p5 = pneg %p2136_p1 }
  0x58   : > { %p2144_p3 = pnand %p2143_p9, %p2137_p5 }
  0x5a   : > { %2147 = shalt.err (!%p2144_p3)
}
  0x5b   : > { %s3046_s0 = smov 4   ;;  %s3047_s29 = smov 64  }
  0x5c   : > { %1941 = dma.hbm_to_vmem [thread:$0]  (!%p2494_p11), %s3045_s1, 4608, %s197_s13, [#allocation6], %s3047_s29, %s3047_s29, %s3046_s0  }
  0x5d   : > { %p3048_p1 = scmp.ne.s32.totalorder %s3044_s11, 0  ;;  %s3050_s18 = sadd.s32 1, %s2304_s27 }
  0x5e   : > { %p3051_p6 = scmp.eq.s32.totalorder %s2308_s28, 0  ;;  %p3052_p12 = scmp.ne.s32.totalorder %s2276_s20, %s2272_s19 }
  0x5f   : > { %s3103_s8 = smov (%p3048_p1, %s31_s8), 0  ;;  %s3105_s18 = smov (!%p3048_p1, %s3050_s18), %s2304_s27 }
  0x60   : > { %3049 = sst [smem:[#allocation21_spill]] %s3103_s8  ;;  %s128_s30 = ssub.s32 %s2300_s26, %s3103_s8 }
  0x61   : > { %p2541_p13 = por %p3052_p12, %p3051_p6  ;;  %p36_p0 = scmp.ge.s32.totalorder %s3105_s18, 2 }
  0x62   : > { %p3054_p5 = pmov %p3052_p12  ;;  %p3055_p9 = scmp.eq.s32.totalorder %s2459_s10, 3 }
  0x63   : > { %s239_s7 = sand.u32 1, %s2276_s20   ;;  %s1609_s11 = sshll.u32 %s2300_s26, 2 }
  0x64   : > { %p2550_p11 = por %p3055_p9, %p3054_p5  ;;  %s3107_s18 = smov (%p36_p0, %s3105_s18), 0 }
  0x65   : > { %s1608_s6 = sshll.u32 %s239_s7, 4  ;;  %s1610_s17 = sshll.u32 %s2304_s27, 3 }
  0x66   : > { %s3056_s13 = scalar_select %p2550_p11, 1, 0 }
  0x67   : > { %s38_s9 = ssub.s32 %s2304_s27, %s3107_s18  ;;  %s247_s8 = sadd.s32 %s1610_s17, %s1609_s11 }
  0x68   : > { %3057 = sst [smem:[#allocation22_spill]] %s3056_s13  ;;  %p39_p3 = scmp.eq.s32.totalorder %s38_s9, 0 }
  0x69   : > { %s129_s1 = sor.u32 %s128_s30, %s38_s9  ;;  %s3058_s5 = sadd.s32 1, %s2288_s23 }
  0x6a   : > { %p130_p8 = scmp.eq.s32.totalorder %s129_s1, 0  ;;  %s3059_s25 = sadd.s32 1, %s2276_s20 }
  0x6b   : > { %s2564_s3 = scalar_select %p39_p3, %s2288_s23, %s3058_s5  }
  0x6c   : > { %s2569_s2 = scalar_select %p130_p8, %s2276_s20, %s3059_s25  }
  0x6d   : > { %s1611_s13 = sshll.u32 %s247_s8, 6  ;;  %s241_s26 = scalar_lea.vmem [#allocation7], %s1608_s6 }
  0x6e   : > { %s250_s24 = sshll.u32 %s241_s26, 4  ;;  %s2574_s15 = scalar_lea.hbm %s2997_s4, %s1611_s13  ;;  %s2576_s24 = int_to_ptr.vmem [resolvable:$true] %s250_s24 }
  0x6f   : > { %p3060_p4 = scmp.lt.s32.totalorder %s2308_s28, 4  ;;  %s2148_s5 = scalar_lea.hbm %s2574_s15, 256 }
  0x70   : > { %p2149_p7 = scmp.ne.s32.totalorder %s2574_s15, %s2148_s5  ;;  %s2153_s26 = scalar_lea.hbm %s2997_s4, 1024 }
  0x71   : > { %p2582_p2 = pnand %p3060_p4, %p2541_p13  ;;  %p2154_p12 = scmp.lt.u32.totalorder %s2574_s15, %s2997_s4 }
  0x72   : > { %p2155_p13 = scmp.lt.u32.totalorder %s2153_s26, %s2148_s5  ;;  %p2157_p5 = scmp.lt.u32.totalorder %s2148_s5, %s2574_s15 }
  0x73   : > { %p2150_p10 = pneg %p2582_p2 }
  0x74   : > { %p2156_p0 = por %p2155_p13, %p2154_p12 }
  0x75   : > { %p2151_p1 = pnand %p2150_p10, %p2149_p7 }
  0x76   : > { %p2158_p9 = por %p2157_p5, %p2156_p0 }
  0x77   : > { %p2152_p6 = pneg %p2151_p1 }
  0x79   : > { %p2159_p3 = pnand %p2158_p9, %p2152_p6 }
  0x7b   : > { %2162 = shalt.err (!%p2159_p3)
}
  0x7c   : > { %s2163_s30 = scalar_lea.vmem %s2576_s24, 256  ;;  %s2314_s21 = smov [#allocation7]  }
  0x7d   : > { %p2164_p8 = scmp.ne.s32.totalorder %s2576_s24, %s2163_s30  ;;  %s2168_s13 = sshll.u32 %s2314_s21, 4  ;;  %s2169_s13 = int_to_ptr.vmem [resolvable:$false] %s2168_s13 }
  0x7e   : > { %s2170_s7 = scalar_lea.vmem %s2169_s13, 512  ;;  %p2171_p1 = scmp.lt.s32.totalorder %s2576_s24, %s2169_s13 }
  0x7f   : > { %p2166_p4 = pnand %p2164_p8, %p2150_p10  ;;  %p2172_p12 = scmp.lt.s32.totalorder %s2170_s7, %s2163_s30 }
  0x81   : > { %p2167_p7 = pneg %p2166_p4  ;;  %p2173_p13 = por %p2172_p12, %p2171_p1 }
  0x83   : > { %p2174_p0 = pnand %p2173_p13, %p2167_p7 }
  0x85   : > { %2177 = shalt.err (!%p2174_p0)
}
  0x86   : > { %1948 = dma.hbm_to_vmem [thread:$0]  (!%p2582_p2), %s2574_s15, 256, %s2576_s24, %s2427_s16, %s3047_s29, %s3047_s29, %s3046_s0  }
  0x87   : > { %p3062_p10 = scmp.ne.s32.totalorder %s3042_s14, 0 }
  0x88   : > { %s3063_s11 = sld [smem:[#allocation18_spill]] (!%p3062_p10)  ;;  %s264_s6 = sand.u32 (!%p3062_p10), 1, %s2459_s10  }
  0x89   : > { %262 = sbr.rel (%p3062_p10) target bundleno = 501 (0x1f5), region = 40  ;;  %s266_s17 = sand.u32 (!%p3062_p10), 1, %s2284_s22  }
  0x8a   : > { %s1613_s9 = sshll.u32 (!%p3062_p10), %s266_s17, 5  ;;  %s265_s5 = scalar_lea.sflag (!%p3062_p10), [#allocation3], %s264_s6 }
  0x8b   : > { %s2619_s19 = scalar_lea.vmem (!%p3062_p10), [#allocation2], %s1613_s9 }
  0x8e   : > { %p3064_p6 = scmp.ne.s32.totalorder (!%p3062_p10), %s3063_s11, 0 }
  0x90   : > { %2251 = dma.done.wait (%p3064_p6), %s265_s5, 512  }
  0x91   : > { %2253 = vsyncadd (%p3064_p6), %s265_s5, 4294966784  ;;  %p3065_p5 = scmp.eq.s32.totalorder %s2459_s10, 0 }
  0x93   : > { %2255 = dma.done.wait (%p3065_p5), [#allocation6], 4608   ;;  %p3066_p2 = pmov %p3065_p5 }
  0x94   : > { %s3067_s24 = sld [smem:[#allocation14_spill]]  ;;  %s3068_s16 = sld [smem:[#allocation19_spill]] }
  0x95   : > { %2257 = vsyncadd (%p3066_p2), [#allocation6], 4294962688 }
  0x9a   : > { %s279_s15 = sand.u32 1, %s3067_s24   ;;  %p3069_p9 = scmp.ne.s32.totalorder %s3068_s16, 0 }
  0x9b   : > { %s2632_s14 = sshll.u32 %s279_s15, 4 }
  0x9c   : > { %s281_s0 = scalar_lea.vmem [#allocation7], %s2632_s14 }
  0x9d   : > { %2259 = dma.done.wait (%p3069_p9), %s265_s5, 256  }
  0x9e   : > { %2261 = vsyncadd (%p3069_p9), %s265_s5, 4294967040  ;;  %s3070_s29 = sld [smem:[#allocation15_spill]]  ;;  %v2050_v0 = vld [vmem:[#allocation5 + $0x80] sm:$0xff]   ;;  %v2052_v2 = vld [vmem:[#allocation5 + $0x88] sm:$0xff]   ;;  %vm411_vm0 = vcmask 1040384   ;;  %vm420_vm2 = vcmask 1044480  }
  0x9f   : > { %v2051_v1 = vld [vmem:[#allocation5 + $0x20] sm:$0xff]   ;;  %1836 = vmatprep.subr.bf16.mxu0 %v2050_v0  ;;  %v2053_v3 = vld [vmem:[#allocation5 + $0x28] sm:$0xff]   ;;  %vm412_vm1 = vsmask.f32 256  ;;  %v2054_v4 = vld [vmem:[#allocation5 + $0x90] sm:$0xff]   ;;  %vm692_vm8 = vcmask 1042432  }
  0xa0   : > { %1837 = vmatpush3.bf16.msra.mxu0 %v2050_v0  ;;  %1788 = vmatprep.subr.bf16.mxu1 %v2051_v1  ;;  %v2055_v5 = vld [vmem:[#allocation5 + $0x30] sm:$0xff]   ;;  %vm421_vm3 = vsmask.f32 4352  ;;  %v2056_v6 = vld [vmem:[#allocation5 + $0x98] sm:$0xff]   ;;  %v2649_v11 = vld [vmem:[#allocation5 + $0xa0] sm:$0xff]   ;;  %vm555_vm9 = vcmask 523264  }
  0xa1   : > { %1789 = vmatpush3.bf16.msra.mxu1 %v2051_v1  ;;  %1838 = vmatprep.subr.bf16.mxu0 %v2052_v2  ;;  %v2057_v7 = vld [vmem:[#allocation5 + $0x38] sm:$0xff]   ;;  %vm2661_vm4 = vmand %vm411_vm0, %vm412_vm1  ;;  %v2665_v25 = vld [vmem:[#allocation5] sm:$0xff]   ;;  %vm457_vm6 = vsmask.f32 3328  ;;  %vm458_vm7 = vsmask.f32 7440 }
  0xa2   : > { %1790 = vmatprep.subr.bf16.mxu1 %v2053_v3  ;;  %vm2669_vm5 = vmand %vm420_vm2, %vm421_vm3  ;;  %vm693_vm12 = vcmask 1046532   ;;  %v2078_v28 = vld [vmem:[#allocation5 + $0xe0] sm:$0xff]   ;;  %s3083_s16 = sld [smem:[#allocation16_spill]]  ;;  %vm1453_vm15 = vcmask 519168   ;;  %s312_s8 = scalar_lea.vmem [#allocation8], %s2632_s14 }
  0xa3   : > { %vm2761_vm11 = vmor %vm457_vm6, %vm458_vm7  ;;  %s2932_s14 = scalar_lea.sflag [#allocation4], %s279_s15 }
  0xa4   : > { %s2640_s10 = sshll.u32 %s3070_s29, 2  ;;  %s1724_s1 = sshll.u32 %s3070_s29, 4  ;;  %1839 = vmatpush3.bf16.msra.mxu0 %v2052_v2  ;;  %vm2794_vm14 = vmor %vm692_vm8, %vm693_vm12  ;;  %v2088_v2 = vld [vmem:[#allocation5 + $0x110] sm:$0xff]  }
  0xa5   : > { %s2644_s25 = sadd.s32 4, %s2640_s10  ;;  %s318_s26 = scalar_lea.vmem %s2619_s19, %s1724_s1 [#allocation2]  ;;  %1791 = vmatpush3.bf16.msra.mxu1 %v2053_v3  ;;  %1840 = vmatprep.subr.bf16.mxu0 %v2054_v4 }
  0xa6   : > { %s1619_s12 = sadd.s32 4294967295, %s2640_s10  ;;  %1792 = vmatprep.subr.bf16.mxu1 %v2055_v5  ;;  %v2058_v8 = vld [vmem:[%s318_s26] ss:$0 sps:$4 sm:$0xff]   ;;  %p335_p3 = scmp.eq.s32.totalorder %s2640_s10, 0  ;;  %v2059_v9 = vld [vmem:[%s318_s26 + $0x4] ss:$0 sps:$4 sm:$0xff]  }
  0xa7   : > { %v2060_v10 = vld [vmem:[%s318_s26 + $0x8] ss:$0 sps:$4 sm:$0xff]   ;;  %p2653_p8 = scmp.gt.s32.totalorder %s1619_s12, 0  ;;  %v2061_v12 = vld [vmem:[%s318_s26 + $0xc] ss:$0 sps:$4 sm:$0xff]   ;;  %v371_v13 = vshrl.u32 %v2058_v8, 16 }
  0xa8   : > { %1841 = vmatpush3.bf16.msra.mxu0 %v2054_v4  ;;  %v374_v14 = vshll.u32 %v2058_v8, 16  ;;  %v378_v15 = vshrl.u32 %v2059_v9, 16  ;;  %v381_v16 = vshll.u32 %v2059_v9, 16  ;;  %v385_v17 = vshrl.u32 %v2060_v10, 16  ;;  %p330_p4 = scmp.lt.s32.totalorder %s2644_s25, 7  ;;  %p340_p7 = scmp.eq.s32.totalorder %s2644_s25, 8 }
  0xa9   : > { %1793 = vmatpush3.bf16.msra.mxu1 %v2055_v5  ;;  %1842 = vmatprep.subr.bf16.mxu0 %v2056_v6  ;;  %v388_v18 = vshll.u32 %v2060_v10, 16  ;;  %v373_v19 = vrot.slane %v371_v13, 7  ;;  %v392_v20 = vshrl.u32 %v2061_v12, 16  ;;  %v395_v21 = vshll.u32 %v2061_v12, 16  ;;  %s3109_s12 = smov (!%p2653_p8, %s1619_s12), 0  ;;  %s1719_s26 = sshll.u32 %s3083_s16, 3 }
  0xaa   : > { %1794 = vmatprep.subr.bf16.mxu1 %v2057_v7  ;;  %v380_v22 = vrot.slane %v378_v15, 7  ;;  %v387_v23 = vrot.slane %v385_v17, 7  ;;  %s2682_s30 = scalar_select %p335_p3, 1, 0 }
  0xab   : > { %v376_v26 = vor.u32 %v374_v14, %v373_v19  ;;  %v394_v27 = vrot.slane %v392_v20, 7  ;;  %s2690_s21 = scalar_select %p330_p4, %s2644_s25, 7 }
  0xac   : > { %1843 = vmatpush3.bf16.msra.mxu0 %v2056_v6  ;;  %v383_v29 = vor.u32 %v381_v16, %v380_v22  ;;  %v390_v30 = vor.u32 %v388_v18, %v387_v23  ;;  %s1620_s13 = sshll.u32 %s3109_s12, 2  ;;  %v337_v40 = vstv %s2682_s30  ;;  %s3084_s25 = sld [smem:[#allocation26_spill]] }
  0xad   : > { %1795 = vmatpush3.bf16.msra.mxu1 %v2057_v7  ;;  %1848 = vmatprep.subr.bf16.mxu0 %v2649_v11  ;;  %v397_v31 = vor.u32 %v395_v21, %v394_v27  ;;  %v415_v32 = vsel %vm2661_vm4, 0, %v376_v26  ;;  %s2711_s7 = scalar_select %p340_p7, 1, 0  ;;  %vm2754_vm10 = vcmp.eq.s32.totalorder %v337_v40, 1 }
  0xae   : > { %1800 = vmatprep.subr.bf16.mxu1 %v2665_v25  ;;  %v416_v33 = vsel %vm2661_vm4, 0, %v383_v29  ;;  %v417_v34 = vsel %vm2661_vm4, 0, %v390_v30  ;;  %v2698_v35 = vsel %vm2669_vm5, %v415_v32, 0  ;;  %s327_s11 = scalar_lea.vmem %s2619_s19, %s1620_s13 [#allocation2]  ;;  %s1621_s6 = sshll.u32 %s2690_s21, 2 }
  0xaf   : > { %v2702_v36 = vsel %vm2669_vm5, %v416_v33, 0  ;;  %v2706_v37 = vsel %vm2669_vm5, %v417_v34, 0  ;;  %v2715_v38 = vcombine.low %v2698_v35, %v2698_v35  ;;  %v2719_v39 = vcombine.high %v2698_v35, %v2698_v35  ;;  %v328_v60 = vld [vmem:[%s327_s11] sm:$0xf]  ;;  %s333_s17 = scalar_lea.vmem %s2619_s19, %s1621_s6 [#allocation2]  ;;  %s3082_s19 = sld [smem:[#allocation25_spill]] }
  0xb0   : > { %v418_v41 = vsel %vm2661_vm4, 0, %v397_v31  ;;  %v2726_v42 = vcombine.low %v2702_v36, %v2702_v36  ;;  %v2730_v43 = vcombine.high %v2702_v36, %v2702_v36  ;;  %v2734_v44 = vcombine.low %v2706_v37, %v2706_v37  ;;  %v334_v18 = vld [vmem:[%s333_s17] sm:$0xf]  ;;  %s1474_s30 = sshll.u32 %s312_s8, 4  ;;  %s2315_s17 = smov [#allocation8]   ;;  %s2925_s30 = int_to_ptr.vmem [resolvable:$true] %s1474_s30 }
  0xb1   : > { %v2738_v45 = vcombine.high %v2706_v37, %v2706_v37  ;;  %v475_v46 = vshrl.u32 %v2715_v38, 16  ;;  %v478_v47 = vshll.u32 %v2715_v38, 16  ;;  %v484_v48 = vshll.u32 %v2719_v39, 16  ;;  %s2178_s6 = scalar_lea.vmem %s2925_s30, 256  ;;  %s2182_s9 = sshll.u32 %s2315_s17, 4  ;;  %s2183_s9 = int_to_ptr.vmem [resolvable:$false] %s2182_s9 }
  0xb2   : > { %v489_v49 = vshrl.u32 %v2726_v42, 16  ;;  %v492_v50 = vshll.u32 %v2726_v42, 16  ;;  %v498_v51 = vshll.u32 %v2730_v43, 16  ;;  %v503_v52 = vshrl.u32 %v2734_v44, 16  ;;  %p2179_p1 = scmp.ne.s32.totalorder %s2925_s30, %s2178_s6  ;;  %s2184_s5 = scalar_lea.vmem %s2183_s9, 512 }
  0xb3   : > { %v2751_v53 = vsel %vm2669_vm5, %v418_v41, 0  ;;  %v477_v54 = vrot.slane %v475_v46, 4  ;;  %v480_v55 = vrot.slane %v478_v47, 5  ;;  %v506_v56 = vshll.u32 %v2734_v44, 16  ;;  %p2185_p0 = scmp.lt.s32.totalorder %s2925_s30, %s2183_s9  ;;  %p2186_p10 = scmp.lt.s32.totalorder %s2184_s5, %s2178_s6 }
  0xb4   : > { %v491_v57 = vrot.slane %v489_v49, 4  ;;  %v494_v58 = vrot.slane %v492_v50, 5  ;;  %v505_v59 = vrot.slane %v503_v52, 4  ;;  %v486_v63 = vrot.slane %v484_v48, 5  ;;  %p2180_p12 = pnand %p2179_p1, %p2550_p11 }
  0xb5   : > { %v481_v62 = vor.u32 %v480_v55, %v477_v54  ;;  %v508_v0 = vrot.slane %v506_v56, 5  ;;  %v512_v1 = vshll.u32 %v2738_v45, 16  ;;  %v500_v4 = vrot.slane %v498_v51, 5  ;;  %v2064_v51 = vld [vmem:[#allocation5 + $0xa8] sm:$0xff]   ;;  %v1715_v32 = vld [vmem:[%s3082_s19] ss:$0 sm:$0xff]  ;;  %p2187_p6 = por %p2186_p10, %p2185_p0 }
  0xb6   : > { %v495_v3 = vor.u32 %v494_v58, %v491_v57  ;;  %v2767_v5 = vcombine.low %v2751_v53, %v2751_v53  ;;  %v2771_v6 = vcombine.high %v2751_v53, %v2751_v53  ;;  %v342_v14 = vstv %s2711_s7  ;;  %s3086_s7 = sld [smem:[#allocation27_spill]]  ;;  %p2181_p13 = pneg %p2180_p12 }
  0xb7   : > { %v482_v7 = vrot.slane %v481_v62, 4  ;;  %v509_v8 = vor.u32 %v508_v0, %v505_v59  ;;  %v514_v16 = vrot.slane %v512_v1, 5  ;;  %v339_v17 = vsel %vm2754_vm10, 0, %v328_v60  ;;  %v2066_v59 = vld [vmem:[#allocation5 + $0xb0] sm:$0xff]  }
  0xb8   : > { %v496_v9 = vrot.slane %v495_v3, 4  ;;  %v909_v10 = vshrl.u32 %v2767_v5, 16  ;;  %v912_v12 = vshll.u32 %v2767_v5, 16  ;;  %v918_v13 = vshll.u32 %v2771_v6, 16  ;;  %p2188_p5 = pnand %p2187_p6, %p2181_p13 }
  0xb9   : > { %v2780_v15 = vsel %vm2761_vm11, %v482_v7, %v486_v63  ;;  %v510_v20 = vrot.slane %v509_v8, 4  ;;  %v701_v23 = vrot.slane %v2719_v39, 5  ;;  %v705_v26 = vrot.slane %v2730_v43, 5  ;;  %v2068_v8 = vld [vmem:[#allocation5 + $0xb8] sm:$0xff]  }
  0xba   : > { %v2786_v19 = vsel %vm2761_vm11, %v496_v9, %v500_v4  ;;  %v911_v21 = vrot.slane %v909_v10, 4  ;;  %v914_v22 = vrot.slane %v912_v12, 5  ;;  %vm343_vm13 = vcmp.eq.s32.totalorder %v342_v14, 1 }
  0xbb   : > { %v1674_v27 = vcombine.low %v2780_v15, %v2786_v19  ;;  %v920_v30 = vrot.slane %v918_v13, 5  ;;  %v1622_v31 = vcombine.low %v339_v17, %v339_v17  ;;  %v1653_v33 = vrot.slane %v2715_v38, 9 }
  0xbc   : > { %v915_v29 = vor.u32 %v914_v22, %v911_v21  ;;  %v1654_v34 = vrot.slane %v2726_v42, 9  ;;  %v515_v39 = vsel %vm2761_vm11, %v510_v20, %v514_v16  ;;  %v344_v46 = vsel %vm343_vm13, 0, %v334_v18  ;;  %v2070_v16 = vld [vmem:[#allocation5 + $0xc0] sm:$0xff]  }
  0xbd   : > { %1844 = vmatprep.mubr.msk.bf16.mxu0 %vm555_vm9, %v1674_v27  ;;  %v364_v41 = vshrl.u32 %v1622_v31, 16  ;;  %v367_v43 = vshll.u32 %v1622_v31, 16  ;;  %v2805_v47 = vsel %vm2794_vm14, %v1653_v33, %v701_v23  ;;  %v1627_v52 = vcombine.low %v344_v46, %v344_v46  ;;  %v2072_v27 = vld [vmem:[#allocation5 + $0xc8] sm:$0xff]  }
  0xbe   : > { %v916_v40 = vrot.slane %v915_v29, 4  ;;  %v2809_v48 = vsel %vm2794_vm14, %v1654_v34, %v705_v26  ;;  %v1664_v55 = vcombine.low %v2698_v35, %v2702_v36  ;;  %v1665_v56 = vcombine.low %v2706_v37, %v2751_v53  ;;  %v2065_v26 = vld [vmem:[#allocation5 + $0x8] sm:$0xff]   ;;  %v2069_v34 = vld [vmem:[#allocation5 + $0x18] sm:$0xff]  }
  0xbf   : > { %v366_v42 = vrot.slane %v364_v41, 7  ;;  %v1683_v49 = vcombine.low %v2805_v47, %v2809_v48  ;;  %v399_v60 = vshrl.u32 %v1627_v52, 16  ;;  %v709_v61 = vrot.slane %v2738_v45, 5 }
  0xc0   : > { %v2813_v38 = vsel %vm2761_vm11, %v916_v40, %v920_v30  ;;  %v1019_v0 = vrot.slane %v2771_v6, 5  ;;  %v1682_v7 = vrot.slane %v2767_v5, 9  ;;  %v402_v9 = vshll.u32 %v1627_v52, 16  ;;  %v2067_v30 = vld [vmem:[#allocation5 + $0x10] sm:$0xff]  }
  0xc1   : > { %v1675_v50 = vcombine.low %v515_v39, %v2813_v38  ;;  %v369_v54 = vor.u32 %v367_v43, %v366_v42  ;;  %v401_v45 = vrot.slane %v399_v60, 7  ;;  %v1637_v20 = vcombine.low %v2786_v19, %v515_v39  ;;  %v2074_v19 = vld [vmem:[#allocation5 + $0xd0] sm:$0xff]   ;;  %v2071_v43 = vld [vmem:[#allocation5 + $0x40] sm:$0xff]  }
  0xc2   : > { %v2846_v6 = vsel %vm2794_vm14, %v1682_v7, %v1019_v0  ;;  %v2082_v60 = vld [vmem:[#allocation5 + $0xf0] sm:$0xff]   ;;  %v2077_v0 = vld [vmem:[#allocation5 + $0x58] sm:$0xff]  }
  0xc3   : > { %1845 = vmatmul.mubr.msk.bf16.vlgmr.msra.gmra.mrb[0].mxu0 %vm555_vm9, %v1675_v50  ;;  %v414_v57 = vsel %vm2661_vm4, 0, %v369_v54  ;;  %v404_v18 = vor.u32 %v402_v9, %v401_v45  ;;  %v2073_v54 = vld [vmem:[#allocation5 + $0x48] sm:$0xff]  }
  0xc4   : > { %1849 = vmatpush3.bf16.msra.mxu0 %v2649_v11  ;;  %1856 = vmatprep.mubr.msk.bf16.mxu0 %vm555_vm9, %v1683_v49  ;;  %v423_v58 = vsel %vm2669_vm5, %v414_v57, 0  ;;  %v1655_v11 = vrot.slane %v2734_v44, 9  ;;  %v2080_v57 = vld [vmem:[#allocation5 + $0xe8] sm:$0xff]  }
  0xc5   : > { %1850 = vmatprep.subr.bf16.mxu0 %v2064_v51  ;;  %v2830_v62 = vcombine.low %v423_v58, %v423_v58  ;;  %v2832_v63 = vcombine.high %v423_v58, %v423_v58  ;;  %v1644_v23 = vcombine.low %v423_v58, %v2698_v35  ;;  %v419_v29 = vsel %vm2661_vm4, 0, %v404_v18  ;;  %v2087_v45 = vld [vmem:[#allocation5 + $0x108] sm:$0xff]  }
  0xc6   : > { %v2842_v44 = vsel %vm2794_vm14, %v1655_v11, %v709_v61  ;;  %v428_v31 = vsel %vm2669_vm5, %v419_v29, 0  ;;  %v2075_v61 = vld [vmem:[#allocation5 + $0x50] sm:$0xff]  }
  0xc7   : > { %v461_v1 = vshrl.u32 %v2830_v62, 16  ;;  %v464_v3 = vshll.u32 %v2830_v62, 16  ;;  %v470_v4 = vshll.u32 %v2832_v63, 16  ;;  %v1684_v17 = vcombine.low %v2842_v44, %v2846_v6 }
  0xc8   : > { %1851 = vmatpush3.bf16.msra.mxu0 %v2064_v51  ;;  %v2867_v24 = vcombine.low %v428_v31, %v428_v31  ;;  %v697_v33 = vrot.slane %v2832_v63, 5  ;;  %v1652_v39 = vrot.slane %v2830_v62, 9  ;;  %v1691_v42 = vcombine.low %v2751_v53, %v428_v31  ;;  %v2084_v63 = vld [vmem:[#allocation5 + $0xf8] sm:$0xff]  }
  0xc9   : > { %1852 = vmatprep.subr.bf16.mxu0 %v2066_v59  ;;  %v463_v10 = vrot.slane %v461_v1, 4  ;;  %v466_v12 = vrot.slane %v464_v3, 5  ;;  %v472_v14 = vrot.slane %v470_v4, 5  ;;  %v2876_v49 = vcombine.high %v428_v31, %v428_v31  ;;  %v2086_v1 = vld [vmem:[#allocation5 + $0x100] sm:$0xff]  }
  0xca   : > { %v1212_v40 = vshrl.u32 %v2867_v24, 16  ;;  %v1215_v41 = vshll.u32 %v2867_v24, 16  ;;  %v698_v46 = vsel %vm2794_vm14, %v1652_v39, %v697_v33  ;;  %v2079_v3 = vld [vmem:[#allocation5 + $0x60] sm:$0xff]   ;;  %v1657_v7 = vcombine.low %v2809_v48, %v2842_v44  ;;  %v2083_v48 = vld [vmem:[#allocation5 + $0x70] sm:$0xff]  }
  0xcb   : > { %v467_v13 = vor.u32 %v466_v12, %v463_v10  ;;  %v1656_v52 = vcombine.low %v698_v46, %v2805_v47  ;;  %v1318_v9 = vrot.slane %v2876_v49, 5  ;;  %v2089_v10 = vld [vmem:[#allocation5 + $0x118] sm:$0xff]  }
  0xcc   : > { %1853 = vmatpush3.bf16.msra.mxu0 %v2066_v59  ;;  %v1214_v50 = vrot.slane %v1212_v40, 4  ;;  %v1217_v51 = vrot.slane %v1215_v41, 5  ;;  %v1221_v59 = vshll.u32 %v2876_v49, 16  ;;  %v2085_v12 = vld [vmem:[#allocation5 + $0x78] sm:$0xff]  }
  0xcd   : > { %1854 = vmatprep.subr.bf16.mxu0 %v2068_v8  ;;  %v468_v5 = vrot.slane %v467_v13, 4 }
  0xce   : > { %v1218_v58 = vor.u32 %v1217_v51, %v1214_v50  ;;  %v1223_v62 = vrot.slane %v1221_v59, 5 }
  0xcf   : > { %v473_v21 = vsel %vm2761_vm11, %v468_v5, %v472_v14  ;;  %v1733_v14 = vld [vmem:[%s281_s0 + $0x8] sm:$0xff]   ;;  %v1726_v5 = vld [vmem:[%s281_s0] sm:$0xff]   ;;  %s1471_s0 = sadd.s32 %s1719_s26, %s2640_s10 }
  0xd0   : > { %1855 = vmatpush3.bf16.msra.mxu0 %v2068_v8  ;;  %v1636_v22 = vcombine.low %v473_v21, %v2780_v15  ;;  %v1645_v15 = vcombine.low %v2702_v36, %v2706_v37  ;;  %v1219_v47 = vrot.slane %v1218_v58, 4  ;;  %v2081_v8 = vld [vmem:[#allocation5 + $0x68] sm:$0xff]   ;;  %v1716_v37 = vld [vmem:[%s3084_s25] ss:$0 sm:$0xff]  ;;  %s1720_s12 = sshll.u32 %s1471_s0, 6 }
  0xd1   : > { %1860 = vmatprep.subr.bf16.mxu0 %v2070_v16  ;;  %s2923_s11 = scalar_lea.hbm %s3086_s7, %s1720_s12 }
  0xd2   : > { %1796 = vmatprep.mubr.msk.bf16.mxu1 %vm555_vm9, %v1636_v22  ;;  %v1224_v11 = vsel %vm2761_vm11, %v1219_v47, %v1223_v62  ;;  %v1731_v22 = vunpack.c.l.bf16 %v1733_v14 }
  0xd3   : > { %1857 = vmatmul.mubr.msk.bf16.vlgmr.msra.gmra.mrb[0].mxu0 %vm555_vm9, %v1684_v17  ;;  %1797 = vmatmul.mubr.msk.bf16.vlgmr.msra.gmra.mrb[0].mxu1 %vm555_vm9, %v1637_v20  ;;  %v1700_v4 = vcombine.low %v2813_v38, %v1224_v11  ;;  %v1707_v38 = vrot.slane %v2867_v24, 9 }
  0xd4   : > { %1861 = vmatpush3.bf16.msra.mxu0 %v2070_v16  ;;  %1801 = vmatpush3.bf16.msra.mxu1 %v2665_v25  ;;  %v2076_v25 = vld [vmem:[#allocation5 + $0xd8] sm:$0xff]  }
  0xd5   : > { %1808 = vmatprep.mubr.msk.bf16.mxu1 %vm555_vm9, %v1644_v23  ;;  %1802 = vmatprep.subr.bf16.mxu1 %v2065_v26  ;;  %v1319_v35 = vsel %vm2794_vm14, %v1707_v38, %v1318_v9 }
  0xd6   : > { %1862 = vmatprep.subr.bf16.mxu0 %v2072_v27  ;;  %1868 = vmatprep.mubr.msk.bf16.mxu0 %vm555_vm9, %v1645_v15  ;;  %v1708_v36 = vcombine.low %v2846_v6, %v1319_v35 }
  0xd8   : > { %1863 = vmatpush3.bf16.msra.mxu0 %v2072_v27  ;;  %1803 = vmatpush3.bf16.msra.mxu1 %v2065_v26  ;;  %v1727_v27 = vunpack.c.l.bf16 %v1726_v5 }
  0xd9   : > { %1864 = vmatprep.subr.bf16.mxu0 %v2074_v19  ;;  %1804 = vmatprep.subr.bf16.mxu1 %v2067_v30 }
  0xdc   : > { %1865 = vmatpush3.bf16.msra.mxu0 %v2074_v19  ;;  %1805 = vmatpush3.bf16.msra.mxu1 %v2067_v30  ;;  %v1732_v30 = vunpack.c.h.bf16 %v1733_v14 }
  0xdd   : > { %1866 = vmatprep.subr.bf16.mxu0 %v2076_v25  ;;  %1806 = vmatprep.subr.bf16.mxu1 %v2069_v34 }
  0xe0   : > { %1867 = vmatpush3.bf16.msra.mxu0 %v2076_v25  ;;  %1807 = vmatpush3.bf16.msra.mxu1 %v2069_v34  ;;  %v1728_v25 = vunpack.c.h.bf16 %v1726_v5 }
  0xe1   : > { %1872 = vmatprep.subr.bf16.mxu0 %v2078_v28  ;;  %1812 = vmatprep.subr.bf16.mxu1 %v2071_v43 }
  0xe3   : > { %1869 = vmatmul.mubr.msk.bf16.vlgmr.msra.gmra.mrb[0].mxu0 %vm555_vm9, %v1691_v42  ;;  %1809 = vmatmul.mubr.msk.bf16.vlgmr.msra.gmra.mrb[0].mxu1 %vm555_vm9, %v1645_v15 }
  0xe4   : > { %1873 = vmatpush3.bf16.msra.mxu0 %v2078_v28  ;;  %1813 = vmatpush3.bf16.msra.mxu1 %v2071_v43 }
  0xe5   : > { %1820 = vmatprep.mubr.msk.bf16.mxu1 %vm555_vm9, %v1656_v52  ;;  %1814 = vmatprep.subr.bf16.mxu1 %v2073_v54 }
  0xe6   : > { %1874 = vmatprep.subr.bf16.mxu0 %v2080_v57  ;;  %1880 = vmatprep.mubr.msk.bf16.mxu0 %vm555_vm9, %v1637_v20 }
  0xe8   : > { %1875 = vmatpush3.bf16.msra.mxu0 %v2080_v57  ;;  %1815 = vmatpush3.bf16.msra.mxu1 %v2073_v54 }
  0xe9   : > { %1876 = vmatprep.subr.bf16.mxu0 %v2082_v60  ;;  %1816 = vmatprep.subr.bf16.mxu1 %v2075_v61 }
  0xec   : > { %1877 = vmatpush3.bf16.msra.mxu0 %v2082_v60  ;;  %1817 = vmatpush3.bf16.msra.mxu1 %v2075_v61 }
  0xed   : > { %1878 = vmatprep.subr.bf16.mxu0 %v2084_v63  ;;  %1818 = vmatprep.subr.bf16.mxu1 %v2077_v0 }
  0xf0   : > { %1879 = vmatpush3.bf16.msra.mxu0 %v2084_v63  ;;  %1819 = vmatpush3.bf16.msra.mxu1 %v2077_v0 }
  0xf1   : > { %1884 = vmatprep.subr.bf16.mxu0 %v2086_v1  ;;  %1824 = vmatprep.subr.bf16.mxu1 %v2079_v3 }
  0xf3   : > { %1881 = vmatmul.mubr.msk.bf16.vlgmr.msra.gmra.mrb[0].mxu0 %vm555_vm9, %v1700_v4  ;;  %1821 = vmatmul.mubr.msk.bf16.vlgmr.msra.gmra.mrb[0].mxu1 %vm555_vm9, %v1657_v7 }
  0xf4   : > { %1885 = vmatpush3.bf16.msra.mxu0 %v2086_v1  ;;  %1825 = vmatpush3.bf16.msra.mxu1 %v2079_v3 }
  0xf5   : > { %1832 = vmatprep.mubr.msk.bf16.mxu1 %vm555_vm9, %v1664_v55  ;;  %1826 = vmatprep.subr.bf16.mxu1 %v2081_v8 }
  0xf6   : > { %1886 = vmatprep.subr.bf16.mxu0 %v2087_v45  ;;  %1892 = vmatprep.mubr.msk.bf16.mxu0 %vm555_vm9, %v1657_v7 }
  0xf8   : > { %1887 = vmatpush3.bf16.msra.mxu0 %v2087_v45  ;;  %1827 = vmatpush3.bf16.msra.mxu1 %v2081_v8 }
  0xf9   : > { %1888 = vmatprep.subr.bf16.mxu0 %v2088_v2  ;;  %1828 = vmatprep.subr.bf16.mxu1 %v2083_v48 }
  0xfc   : > { %1889 = vmatpush3.bf16.msra.mxu0 %v2088_v2  ;;  %1829 = vmatpush3.bf16.msra.mxu1 %v2083_v48 }
  0xfd   : > { %1890 = vmatprep.subr.bf16.mxu0 %v2089_v10  ;;  %1830 = vmatprep.subr.bf16.mxu1 %v2085_v12 }
 0x100   : > { %1891 = vmatpush3.bf16.msra.mxu0 %v2089_v10  ;;  %1831 = vmatpush3.bf16.msra.mxu1 %v2085_v12 }
 0x103   : > { %1893 = vmatmul.mubr.msk.bf16.vlgmr.msra.gmra.mrb[0].mxu0 %vm555_vm9, %v1708_v36  ;;  %1833 = vmatmul.mubr.msk.bf16.vlgmr.msra.gmra.mrb[0].mxu1 %vm555_vm9, %v1665_v56 }
 0x1d6   : > { %v1894_v55 = vpop.f32.mrb[0].mxu0  ;;  %v1834_v13 = vpop.f32.mrb[0].mxu1 }
 0x1d7   : > { %v1392_v44 = vpop.f32.mrb[1].mxu0  ;;  %v886_v6 = vpop.f32.mrb[1].mxu1  ;;  %v1896_v16 = vadd.f32 %v1894_v55, %v1834_v13 }
 0x1d8   : > { %v1895_v17 = vpop.f32.mrb[2].mxu0  ;;  %v1835_v18 = vpop.f32.mrb[2].mxu1  ;;  %v1897_v53 = vadd.f32 %v1392_v44, %v886_v6 }
 0x1d9   : > { %v1395_v56 = vpop.f32.mrb[3].mxu0  ;;  %v889_v20 = vpop.f32.mrb[3].mxu1  ;;  %v1420_v21 = vmul.f32 %v1896_v16, %v1715_v32  ;;  %v1898_v23 = vadd.f32 %v1895_v17, %v1835_v18 }
 0x1da   : > { %v1418_v26 = vmul.f32 %v1897_v53, %v1715_v32  ;;  %v1899_v29 = vadd.f32 %v1395_v56, %v889_v20 }
 0x1db   : > { %v1431_v15 = vadd.f32 %v1716_v37, %v1420_v21  ;;  %v1421_v19 = vmul.f32 %v1898_v23, %v1715_v32 }
 0x1dc   : > { %v1429_v31 = vadd.f32 %v1716_v37, %v1418_v26  ;;  %v1419_v24 = vmul.f32 %v1899_v29, %v1715_v32 }
 0x1dd   : > { %v1443_v33 = vadd.f32 %v1731_v22, %v1431_v15  ;;  %v1432_v34 = vadd.f32 %v1716_v37, %v1421_v19 }
 0x1de   : > { %v1441_v39 = vadd.f32 %v1727_v27, %v1429_v31  ;;  %v1430_v40 = vadd.f32 %v1716_v37, %v1419_v24 }
 0x1df   : > { %v1447_v41 = vmax.f32 %v1443_v33, 0.0  ;;  %v1444_v28 = vadd.f32 %v1732_v30, %v1432_v34 }
 0x1e0   : > { %v1445_v43 = vmax.f32 %v1441_v39, 0.0  ;;  %v1442_v46 = vadd.f32 %v1728_v25, %v1430_v40 }
 0x1e1   : > { %v1451_v42 = vpack.c.bf16 %v1447_v41, %v1447_v41  ;;  %v1448_v49 = vmax.f32 %v1444_v28, 0.0 }
 0x1e2   : > { %v1449_v50 = vpack.c.bf16 %v1445_v43, %v1445_v43  ;;  %v1446_v51 = vmax.f32 %v1442_v46, 0.0 }
 0x1e3   : > { %1456 = vst.msk [vmem:[%s312_s8 + $0x8] sm:$0xf] %vm1453_vm15, %v1451_v42  ;;  %v1452_v52 = vpack.c.bf16 %v1448_v49, %v1448_v49 }
 0x1e4   : > { %1454 = vst.msk [vmem:[%s312_s8] sm:$0xf] %vm1453_vm15, %v1449_v50  ;;  %v1450_v54 = vpack.c.bf16 %v1446_v51, %v1446_v51 }
 0x1e5   : > { %1457 = vst.msk [vmem:[%s312_s8 + $0xc] sm:$0xf] %vm1453_vm15, %v1452_v52 }
 0x1e6   : > { %1455 = vst.msk [vmem:[%s312_s8 + $0x4] sm:$0xf] %vm1453_vm15, %v1450_v54 }
 0x1e7   : > { %2191 = shalt.err (!%p2188_p5)
}
 0x1e8   : > { %s2192_s24 = scalar_lea.hbm %s2923_s11, 256  ;;  %s2196_s16 = scalar_lea.hbm %s3086_s7, 1024 }
 0x1e9   : > { %p2193_p2 = scmp.ne.s32.totalorder %s2923_s11, %s2192_s24  ;;  %p2197_p8 = scmp.lt.u32.totalorder %s2923_s11, %s3086_s7 }
 0x1ea   : > { %p2198_p4 = scmp.lt.u32.totalorder %s2196_s16, %s2192_s24  ;;  %p2200_p1 = scmp.lt.u32.totalorder %s2192_s24, %s2923_s11 }
 0x1eb   : > { %p2194_p9 = pnand %p2193_p2, %p2550_p11 }
 0x1ec   : > { %p2199_p7 = por %p2198_p4, %p2197_p8 }
 0x1ed   : > { %p2195_p3 = pneg %p2194_p9 }
 0x1ee   : > { %p2201_p12 = por %p2200_p1, %p2199_p7 }
 0x1f0   : > { %p2202_p13 = pnand %p2201_p12, %p2195_p3 }
 0x1f2   : > { %2205 = shalt.err (!%p2202_p13)
}
 0x1f3   : > { %s2316_s25 = smov 64   ;;  %s2317_s26 = smov 4  }
 0x1f4   : > { %1936 = dma.vmem_to_hbm [thread:$0]  (%p2550_p11), %s2925_s30, 256, %s2923_s11, %s2932_s14, %s2316_s25, %s2316_s25, %s2317_s26  }
 0x1f5 PF: > { %s3087_s0 = sld [smem:[#allocation13_spill]]  ;;  %s3088_s12 = sld [smem:[#allocation20_spill]] }
 0x1f6   : > { %p1956_p0 = scmp.ge.s32.totalorder %s2308_s28, 2 }
 0x1fb   : > { %s1489_s8 = sand.u32 1, %s3087_s0   ;;  %p3089_p10 = scmp.ne.s32.totalorder %s3088_s12, 0 }
 0x1fc   : > { %s1490_s10 = scalar_lea.sflag [#allocation4], %s1489_s8 }
 0x1fd   : > { %p1950_p6 = pnand %p1956_p0, %p3089_p10 }
 0x1ff   : > { %2263 = dma.done.wait (!%p1950_p6), %s1490_s10, 256  }
 0x200   : > { %2265 = vsyncadd (!%p1950_p6), %s1490_s10, 4294967040  ;;  %s22_s28 = sadd.s32 1, %s2308_s28   ;;  %s3090_s13 = sld [smem:[#allocation14_spill]] }
 0x201   : > { %p19_p5 = scmp.ge.s32.totalorder %s22_s28, 6   ;;  %s3091_s24 = sld [smem:[#allocation17_spill]] }
 0x202   : > { %s3092_s26 = sld [smem:[#allocation21_spill]]  ;;  %s3093_s30 = smov %s3107_s18 }
 0x203   : > { %s3095_s19 = smov %s2276_s20  ;;  %s3096_s20 = smov %s2569_s2 }
 0x204   : > { %s3097_s21 = smov %s2284_s22  ;;  %s3098_s22 = smov %s2288_s23 }
 0x205   : > { %s3099_s23 = smov %s2564_s3  ;;  %s3100_s25 = smov %s2304_s27 }
 0x206   : > { %s3094_s18 = smov %s3090_s13  ;;  %s3101_s27 = smov %s3093_s30 }
 0x207   :  { %21 = sbr.rel (!%p19_p5) target bundleno = 16 (0x10), region = 111 }
 0x20e   :  { %1495 = vsyncpa [#allocation3], 1 }
 0x20f   :  { %1497 = vsyncpa [#allocation3 + $0x1], 1 }
 0x210   :  { %1498 = vsyncpa [#allocation6], 1 }
 0x211   :  { %1499 = vsyncpa [#allocation4], 1 }
 0x212   :  { %1501 = vsyncpa [#allocation4 + $0x1], 1 }

</bundles_post_ra>
